<compile_context>
chip_gen: v7x
topology: tpu7x:2x2x1
jax: 0.10.0
libtpu: 0.0.40
codegen_flags: <defaults>
</compile_context>

<pallas_src>
import numpy as np
import jax
import jax.numpy as jnp
from jax import lax
from jax.experimental import pallas as pl
from jax.experimental.pallas import tpu as pltpu


def fused_conv_kernel(xpad_ref, w1_ref, b1_ref, w2_ref, b2_ref, f1_ref, f2_ref):
    """Fused conv1 -> ReLU -> conv2 for one batch element (all lane-dense).

    xpad_ref: (1, H+2, Wp*Cin)   spatially padded input rows (Wp = W+2)
    w1_ref  : (3, Wp*Cin, W*C1)  per-kh block-banded conv1 weights (kw folded)
    b1_ref  : (1, W*C1)          conv1 bias tiled over W
    w2_ref  : (3, W*C1, W*C2)    per-kh block-banded conv2 weights (kw folded)
    b2_ref  : (1, W*C2)          conv2 bias tiled over W
    f1_ref  : (1, H, W*C1)       conv1 output (hooked feature 1)
    f2_ref  : (1, H, W*C2)       conv2 output (hooked feature 2)
    """
    H = f1_ref.shape[1]
    wc1 = f1_ref.shape[2]

    # conv1: kh folded into 3 row-shifted matmuls on the padded rows,
    # kw (and the W zero-pad) folded into the banded weights.
    xp = xpad_ref[0]                                        # (H+2, Wp*Cin)
    y1 = jnp.dot(xp[0:H, :], w1_ref[0], preferred_element_type=jnp.float32)
    y1 = y1 + jnp.dot(xp[1:H + 1, :], w1_ref[1], preferred_element_type=jnp.float32)
    y1 = y1 + jnp.dot(xp[2:H + 2, :], w1_ref[2], preferred_element_type=jnp.float32)
    y1 = y1 + b1_ref[...]
    f1_ref[0] = y1.astype(f1_ref.dtype)

    # ReLU; the activation stays on-core (no HBM round trip).
    a1 = jnp.maximum(y1, 0.0)                               # (H, W*C1)
    zrow = jnp.zeros((1, wc1), jnp.float32)
    a_up = jnp.concatenate([zrow, a1[:H - 1, :]], axis=0)   # row h-1 (zero at h=0)
    a_dn = jnp.concatenate([a1[1:, :], zrow], axis=0)       # row h+1 (zero at h=H-1)

    # conv2: three row-banded matmuls, K = W*C1 = 128 (MXU-native), lane-dense out.
    y2 = jnp.dot(a_up, w2_ref[0], preferred_element_type=jnp.float32)
    y2 = y2 + jnp.dot(a1, w2_ref[1], preferred_element_type=jnp.float32)
    y2 = y2 + jnp.dot(a_dn, w2_ref[2], preferred_element_type=jnp.float32)
    f2_ref[0] = (y2 + b2_ref[...]).astype(f2_ref.dtype)


def _kw_shift_matrices(w_in, w_out, offset):
    """S[kw, wi, wo] = 1 iff wi == wo + kw + offset (zero pad handled implicitly)."""
    s = np.zeros((3, w_in, w_out), np.float32)
    for kw in range(3):
        for wo in range(w_out):
            wi = wo + kw + offset
            if 0 <= wi < w_in:
                s[kw, wi, wo] = 1.0
    return s


def _banded_weight(w_hwio, shift):
    """(3,3,Ci,Co) HWIO weight -> (3, Win*Ci, Wout*Co) per-kh block-banded matrices."""
    _, _, ci, co = w_hwio.shape
    w_in, w_out = shift.shape[1], shift.shape[2]
    b = jnp.einsum("kaw,hkio->haiwo", jnp.asarray(shift, w_hwio.dtype), w_hwio)
    return b.reshape(3, w_in * ci, w_out * co)


@jax.jit
def feature_extractor_forward(x_nchw, params):
    """Equivalent of FeatureExtractor(model, layers=["conv1", "conv2"]).forward(x).

    Runs the wrapped model and returns the hooked intermediate outputs (NCHW),
    i.e. the raw Conv2d outputs of conv1 and conv2.
    """
    n, cin, h, w = x_nchw.shape
    c1 = params["conv1_b"].shape[0]
    c2 = params["conv2_b"].shape[0]
    hp, wp = h + 2, w + 2

    # NCHW -> lane-dense, spatially padded rows (N, Hp, Wp*Cin).  kh is handled
    # in-kernel by row-shifted matmuls (no 3x im2col blow-up of the input).
    x_nhwc = jnp.transpose(x_nchw, (0, 2, 3, 1))
    x_pad = jnp.pad(x_nhwc, ((0, 0), (1, 1), (1, 1), (0, 0))).reshape(n, hp, wp * cin)

    # Block-banded weights: kw shifts (and zero padding along W) folded in once.
    w1_big = _banded_weight(params["conv1_w"], _kw_shift_matrices(wp, w, 0))    # (3, Wp*Cin, W*C1)
    w2_big = _banded_weight(params["conv2_w"], _kw_shift_matrices(w, w, -1))    # (3, W*C1, W*C2)
    b1_big = jnp.tile(params["conv1_b"], w).reshape(1, w * c1)
    b2_big = jnp.tile(params["conv2_b"], w).reshape(1, w * c2)

    grid_spec = pltpu.PrefetchScalarGridSpec(
        num_scalar_prefetch=0,
        grid=(n,),
        in_specs=[
            pl.BlockSpec((1, hp, wp * cin), lambda i: (i, 0, 0)),
            pl.BlockSpec((3, wp * cin, w * c1), lambda i: (0, 0, 0)),
            pl.BlockSpec((1, w * c1), lambda i: (0, 0)),
            pl.BlockSpec((3, w * c1, w * c2), lambda i: (0, 0, 0)),
            pl.BlockSpec((1, w * c2), lambda i: (0, 0)),
        ],
        out_specs=[
            pl.BlockSpec((1, h, w * c1), lambda i: (i, 0, 0)),
            pl.BlockSpec((1, h, w * c2), lambda i: (i, 0, 0)),
        ],
    )
    f1, f2 = pl.pallas_call(
        fused_conv_kernel,
        out_shape=(
            jax.ShapeDtypeStruct((n, h, w * c1), jnp.float32),
            jax.ShapeDtypeStruct((n, h, w * c2), jnp.float32),
        ),
        grid_spec=grid_spec,
        compiler_params=pltpu.CompilerParams(dimension_semantics=("parallel",)),
    )(x_pad, w1_big, b1_big, w2_big, b2_big)

    # Lane-dense (N, H, W*C) -> NCHW to match PyTorch hook outputs.
    feat1 = jnp.transpose(f1.reshape(n, h, w, c1), (0, 3, 1, 2))
    feat2 = jnp.transpose(f2.reshape(n, h, w, c2), (0, 3, 1, 2))
    return [feat1, feat2]


def init_params(key):
    k1, k2, k3, k4 = jax.random.split(key, 4)
    return {
        # weights stored HWIO (kh, kw, cin, cout); bias (cout,)
        "conv1_w": 0.1 * jax.random.normal(k1, (3, 3, 4, 8), jnp.float32),
        "conv1_b": 0.1 * jax.random.normal(k2, (8,), jnp.float32),
        "conv2_w": 0.1 * jax.random.normal(k3, (3, 3, 8, 16), jnp.float32),
        "conv2_b": 0.1 * jax.random.normal(k4, (16,), jnp.float32),
    }


def _reference_forward(x_nchw, params):
    """Pure-JAX (XLA) reference for correctness checking."""
    def conv(x, w_hwio, b):
        w_oihw = jnp.transpose(w_hwio, (3, 2, 0, 1))
        y = lax.conv_general_dilated(
            x, w_oihw, window_strides=(1, 1), padding=((1, 1), (1, 1)),
            dimension_numbers=("NCHW", "OIHW", "NCHW"))
        return y + b[None, :, None, None]

    f1 = conv(x_nchw, params["conv1_w"], params["conv1_b"])
    a1 = jnp.maximum(f1, 0.0)
    f2 = conv(a1, params["conv2_w"], params["conv2_b"])
    return [f1, f2]


if __name__ == "__main__":
    key = jax.random.PRNGKey(0)
    kx, kp = jax.random.split(key)
    x = jax.random.normal(kx, (2, 4, 16, 16), jnp.float32)        # NCHW like PyTorch
    params = init_params(kp)

    feats = feature_extractor_forward(x, params)
    feats = [jax.block_until_ready(f) for f in feats]

    ref = _reference_forward(x, params)
    for got, want in zip(feats, ref):
        assert got.shape == want.shape, (got.shape, want.shape)
        np.testing.assert_allclose(np.asarray(got), np.asarray(want),
                                   rtol=1e-4, atol=1e-4)

    print("KERNEL_OK")
</pallas_src>

<mosaic_0001>
module attributes {stable_mosaic.version = 11 : i64} {
  func.func @fused_conv_kernel(%arg0: i32, %arg1: memref<1x18x72xf32, #tpu.memory_space<vmem>>, %arg2: memref<3x72x128xf32, #tpu.memory_space<vmem>>, %arg3: memref<1x128xf32, #tpu.memory_space<vmem>>, %arg4: memref<3x128x256xf32, #tpu.memory_space<vmem>>, %arg5: memref<1x256xf32, #tpu.memory_space<vmem>>, %arg6: memref<1x16x128xf32, #tpu.memory_space<vmem>>, %arg7: memref<1x16x256xf32, #tpu.memory_space<vmem>>) attributes {dimension_semantics = [#tpu.dimension_semantics<parallel>], iteration_bounds = array<i64: 2>, scalar_prefetch = 0 : i64, scratch_operands = 0 : i64, tpu.core_type = #tpu.core_type<tc>, window_params = [{transform_indices = @transform_0, window_bounds = array<i64: 1, 18, 72>}, {pipeline_mode = #tpu.pipeline_mode<synchronous>, transform_indices = @transform_1, window_bounds = array<i64: 3, 72, 128>}, {pipeline_mode = #tpu.pipeline_mode<synchronous>, transform_indices = @transform_2, window_bounds = array<i64: 1, 128>}, {pipeline_mode = #tpu.pipeline_mode<synchronous>, transform_indices = @transform_3, window_bounds = array<i64: 3, 128, 256>}, {pipeline_mode = #tpu.pipeline_mode<synchronous>, transform_indices = @transform_4, window_bounds = array<i64: 1, 256>}, {transform_indices = @transform_5, window_bounds = array<i64: 1, 16, 128>}, {transform_indices = @transform_6, window_bounds = array<i64: 1, 16, 256>}]} {
    %c0 = arith.constant 0 : index
    %c0_0 = arith.constant 0 : index
    %c0_1 = arith.constant 0 : index
    %0 = vector.load %arg1[%c0, %c0_0, %c0_1] : memref<1x18x72xf32, #tpu.memory_space<vmem>>, vector<1x18x72xf32>
    %1 = vector.shape_cast %0 : vector<1x18x72xf32> to vector<18x72xf32>
    %2 = vector.extract_strided_slice %1 {offsets = [0, 0], sizes = [16, 72], strides = [1, 1]} : vector<18x72xf32> to vector<16x72xf32>
    %c0_2 = arith.constant 0 : index
    %c0_3 = arith.constant 0 : index
    %c0_4 = arith.constant 0 : index
    %3 = vector.load %arg2[%c0_2, %c0_3, %c0_4] : memref<3x72x128xf32, #tpu.memory_space<vmem>>, vector<1x72x128xf32>
    %4 = vector.shape_cast %3 : vector<1x72x128xf32> to vector<72x128xf32>
    %cst = arith.constant dense<0.000000e+00> : vector<16x128xf32>
    %5 = tpu.matmul %2, %4, %cst {dimension_numbers = #tpu.dot_dimension_numbers<[1], [0], [0], [1], [0, 0, 1, 1], [], []>} : vector<16x72xf32>, vector<72x128xf32>, vector<16x128xf32> -> vector<16x128xf32>
    %6 = vector.extract_strided_slice %1 {offsets = [1, 0], sizes = [16, 72], strides = [1, 1]} : vector<18x72xf32> to vector<16x72xf32>
    %c1 = arith.constant 1 : index
    %c0_5 = arith.constant 0 : index
    %c0_6 = arith.constant 0 : index
    %7 = vector.load %arg2[%c1, %c0_5, %c0_6] : memref<3x72x128xf32, #tpu.memory_space<vmem>>, vector<1x72x128xf32>
    %8 = vector.shape_cast %7 : vector<1x72x128xf32> to vector<72x128xf32>
    %cst_7 = arith.constant dense<0.000000e+00> : vector<16x128xf32>
    %9 = tpu.matmul %6, %8, %cst_7 {dimension_numbers = #tpu.dot_dimension_numbers<[1], [0], [0], [1], [0, 0, 1, 1], [], []>} : vector<16x72xf32>, vector<72x128xf32>, vector<16x128xf32> -> vector<16x128xf32>
    %10 = arith.addf %5, %9 : vector<16x128xf32>
    %11 = vector.extract_strided_slice %1 {offsets = [2, 0], sizes = [16, 72], strides = [1, 1]} : vector<18x72xf32> to vector<16x72xf32>
    %c2 = arith.constant 2 : index
    %c0_8 = arith.constant 0 : index
    %c0_9 = arith.constant 0 : index
    %12 = vector.load %arg2[%c2, %c0_8, %c0_9] : memref<3x72x128xf32, #tpu.memory_space<vmem>>, vector<1x72x128xf32>
    %13 = vector.shape_cast %12 : vector<1x72x128xf32> to vector<72x128xf32>
    %cst_10 = arith.constant dense<0.000000e+00> : vector<16x128xf32>
    %14 = tpu.matmul %11, %13, %cst_10 {dimension_numbers = #tpu.dot_dimension_numbers<[1], [0], [0], [1], [0, 0, 1, 1], [], []>} : vector<16x72xf32>, vector<72x128xf32>, vector<16x128xf32> -> vector<16x128xf32>
    %15 = arith.addf %10, %14 : vector<16x128xf32>
    %c0_11 = arith.constant 0 : index
    %c0_12 = arith.constant 0 : index
    %16 = vector.load %arg3[%c0_11, %c0_12] : memref<1x128xf32, #tpu.memory_space<vmem>>, vector<1x128xf32>
    %17 = vector.broadcast %16 : vector<1x128xf32> to vector<16x128xf32>
    %18 = arith.addf %15, %17 : vector<16x128xf32>
    %c0_13 = arith.constant 0 : index
    %c0_14 = arith.constant 0 : index
    %c0_15 = arith.constant 0 : index
    %19 = vector.load %arg6[%c0_13, %c0_14, %c0_15] : memref<1x16x128xf32, #tpu.memory_space<vmem>>, vector<1x16x128xf32>
    %20 = vector.shape_cast %19 : vector<1x16x128xf32> to vector<16x128xf32>
    %21 = vector.shape_cast %18 : vector<16x128xf32> to vector<1x16x128xf32>
    tpu.vector_store %arg6[%c0_13, %c0_14, %c0_15], %21 {strides = array<i32>} : memref<1x16x128xf32, #tpu.memory_space<vmem>>, vector<1x16x128xf32>,
    %cst_16 = arith.constant 0.000000e+00 : f32
    %22 = vector.broadcast %cst_16 : f32 to vector<16x128xf32>
    %23 = arith.maximumf %18, %22 : vector<16x128xf32>
    %cst_17 = arith.constant 0.000000e+00 : f32
    %24 = vector.broadcast %cst_17 : f32 to vector<1x128xf32>
    %25 = vector.extract_strided_slice %23 {offsets = [0, 0], sizes = [15, 128], strides = [1, 1]} : vector<16x128xf32> to vector<15x128xf32>
    %26 = tpu.concatenate %24, %25 in 0 : vector<1x128xf32>, vector<15x128xf32> -> vector<16x128xf32>
    %27 = vector.extract_strided_slice %23 {offsets = [1, 0], sizes = [15, 128], strides = [1, 1]} : vector<16x128xf32> to vector<15x128xf32>
    %28 = tpu.concatenate %27, %24 in 0 : vector<15x128xf32>, vector<1x128xf32> -> vector<16x128xf32>
    %c0_18 = arith.constant 0 : index
    %c0_19 = arith.constant 0 : index
    %c0_20 = arith.constant 0 : index
    %29 = vector.load %arg4[%c0_18, %c0_19, %c0_20] : memref<3x128x256xf32, #tpu.memory_space<vmem>>, vector<1x128x256xf32>
    %30 = vector.shape_cast %29 : vector<1x128x256xf32> to vector<128x256xf32>
    %cst_21 = arith.constant dense<0.000000e+00> : vector<16x256xf32>
    %31 = tpu.matmul %26, %30, %cst_21 {dimension_numbers = #tpu.dot_dimension_numbers<[1], [0], [0], [1], [0, 0, 1, 1], [], []>} : vector<16x128xf32>, vector<128x256xf32>, vector<16x256xf32> -> vector<16x256xf32>
    %c1_22 = arith.constant 1 : index
    %c0_23 = arith.constant 0 : index
    %c0_24 = arith.constant 0 : index
    %32 = vector.load %arg4[%c1_22, %c0_23, %c0_24] : memref<3x128x256xf32, #tpu.memory_space<vmem>>, vector<1x128x256xf32>
    %33 = vector.shape_cast %32 : vector<1x128x256xf32> to vector<128x256xf32>
    %cst_25 = arith.constant dense<0.000000e+00> : vector<16x256xf32>
    %34 = tpu.matmul %23, %33, %cst_25 {dimension_numbers = #tpu.dot_dimension_numbers<[1], [0], [0], [1], [0, 0, 1, 1], [], []>} : vector<16x128xf32>, vector<128x256xf32>, vector<16x256xf32> -> vector<16x256xf32>
    %35 = arith.addf %31, %34 : vector<16x256xf32>
    %c2_26 = arith.constant 2 : index
    %c0_27 = arith.constant 0 : index
    %c0_28 = arith.constant 0 : index
    %36 = vector.load %arg4[%c2_26, %c0_27, %c0_28] : memref<3x128x256xf32, #tpu.memory_space<vmem>>, vector<1x128x256xf32>
    %37 = vector.shape_cast %36 : vector<1x128x256xf32> to vector<128x256xf32>
    %cst_29 = arith.constant dense<0.000000e+00> : vector<16x256xf32>
    %38 = tpu.matmul %28, %37, %cst_29 {dimension_numbers = #tpu.dot_dimension_numbers<[1], [0], [0], [1], [0, 0, 1, 1], [], []>} : vector<16x128xf32>, vector<128x256xf32>, vector<16x256xf32> -> vector<16x256xf32>
    %39 = arith.addf %35, %38 : vector<16x256xf32>
    %c0_30 = arith.constant 0 : index
    %c0_31 = arith.constant 0 : index
    %40 = vector.load %arg5[%c0_30, %c0_31] : memref<1x256xf32, #tpu.memory_space<vmem>>, vector<1x256xf32>
    %41 = vector.broadcast %40 : vector<1x256xf32> to vector<16x256xf32>
    %42 = arith.addf %39, %41 : vector<16x256xf32>
    %c0_32 = arith.constant 0 : index
    %c0_33 = arith.constant 0 : index
    %c0_34 = arith.constant 0 : index
    %43 = vector.load %arg7[%c0_32, %c0_33, %c0_34] : memref<1x16x256xf32, #tpu.memory_space<vmem>>, vector<1x16x256xf32>
    %44 = vector.shape_cast %43 : vector<1x16x256xf32> to vector<16x256xf32>
    %45 = vector.shape_cast %42 : vector<16x256xf32> to vector<1x16x256xf32>
    tpu.vector_store %arg7[%c0_32, %c0_33, %c0_34], %45 {strides = array<i32>} : memref<1x16x256xf32, #tpu.memory_space<vmem>>, vector<1x16x256xf32>,
    return
  }
  func.func @transform_0(%arg0: i32) -> (i32, i32, i32) {
    %c0_i32 = arith.constant 0 : i32
    %c0_i32_0 = arith.constant 0 : i32
    %c0_i32_1 = arith.constant 0 : i32
    return %arg0, %c0_i32, %c0_i32_0 : i32, i32, i32
  }
  func.func @transform_1(%arg0: i32) -> (i32, i32, i32) {
    %c0_i32 = arith.constant 0 : i32
    %c0_i32_0 = arith.constant 0 : i32
    %c0_i32_1 = arith.constant 0 : i32
    %c0_i32_2 = arith.constant 0 : i32
    return %c0_i32, %c0_i32_0, %c0_i32_1 : i32, i32, i32
  }
  func.func @transform_2(%arg0: i32) -> (i32, i32) {
    %c0_i32 = arith.constant 0 : i32
    %c0_i32_0 = arith.constant 0 : i32
    %c0_i32_1 = arith.constant 0 : i32
    return %c0_i32, %c0_i32_0 : i32, i32
  }
  func.func @transform_3(%arg0: i32) -> (i32, i32, i32) {
    %c0_i32 = arith.constant 0 : i32
    %c0_i32_0 = arith.constant 0 : i32
    %c0_i32_1 = arith.constant 0 : i32
    %c0_i32_2 = arith.constant 0 : i32
    return %c0_i32, %c0_i32_0, %c0_i32_1 : i32, i32, i32
  }
  func.func @transform_4(%arg0: i32) -> (i32, i32) {
    %c0_i32 = arith.constant 0 : i32
    %c0_i32_0 = arith.constant 0 : i32
    %c0_i32_1 = arith.constant 0 : i32
    return %c0_i32, %c0_i32_0 : i32, i32
  }
  func.func @transform_5(%arg0: i32) -> (i32, i32, i32) {
    %c0_i32 = arith.constant 0 : i32
    %c0_i32_0 = arith.constant 0 : i32
    %c0_i32_1 = arith.constant 0 : i32
    return %arg0, %c0_i32, %c0_i32_0 : i32, i32, i32
  }
  func.func @transform_6(%arg0: i32) -> (i32, i32, i32) {
    %c0_i32 = arith.constant 0 : i32
    %c0_i32_0 = arith.constant 0 : i32
    %c0_i32_1 = arith.constant 0 : i32
    return %arg0, %c0_i32, %c0_i32_0 : i32, i32, i32
  }
}

</mosaic_0001>

<bundles_post_ra>
// kernel: tile.18
= control target key start
LH: loop header
LB: loop body
LE: loop exit
PB: predicated region body
PF: predicated region fallthrough
CT: control target
= control target key end

     0   :  { %s28_s0 = inlined_call_operand.vmem [shape: f32[16], index: 0, kind: input, shape index: {}]   ;;  %s29_s1 = inlined_call_operand.vmem [shape: f32[16,16], index: 1, kind: output, shape index: {}]  }
   0x1   :  { %v4_v0 = vld [vmem:[%s28_s0] ss:$0 sm:$0xff] }
   0x2   :  { %5 = vst [vmem:[%s29_s1] sm:$0xff] %v4_v0  ;;  %8 = vst [vmem:[%s29_s1 + $0x8] sm:$0xff] %v4_v0 }

// kernel: tile.19
= control target key start
LH: loop header
LB: loop body
LE: loop exit
PB: predicated region body
PF: predicated region fallthrough
CT: control target
= control target key end

     0   :  { %s7_s6 = smov 3  ;;  %s21_s9 = smov 3  ;;  %vm4_vm0 = vcmask 130048   ;;  %vm11_vm1 = vcmask 1048448   ;;  %vm18_vm2 = vcmask 917248   ;;  %vm25_vm3 = vcmask 786048   ;;  %s128_s0 = inlined_call_operand.vmem [shape: f32[16,16], index: 0, kind: input, shape index: {}]   ;;  %s129_s1 = inlined_call_operand.vmem [shape: f32[1,256], index: 1, kind: output, shape index: {}]  }
   0x1   :  { %v66_v0 = vld [vmem:[%s128_s0 + $0x7] ss:$8 sm:%s7_s6]   ;;  %s81_s10 = smov 112   ;;  %v68_v1 = vld [vmem:[%s128_s0 + $0x5] ss:$8 sm:%s21_s9]   ;;  %s14_s13 = smov 3 }
   0x2   :  { %9 = vrot.lane.b32.xlu0 %v66_v0, %s81_s10  ;;  %s82_s14 = smov 80   ;;  %v67_v2 = vld [vmem:[%s128_s0 + $0x6] ss:$8 sm:%s14_s13]   ;;  %s28_s17 = smov 3  ;;  %vm32_vm4 = vcmask 654848   ;;  %vm39_vm5 = vcmask 523648  }
   0x3   :  { %23 = vrot.lane.b32.xlu1 %v68_v1, %s82_s14  ;;  %v69_v3 = vld [vmem:[%s128_s0 + $0x4] ss:$8 sm:%s28_s17]   ;;  %s35_s20 = smov 3  ;;  %s42_s21 = smov 3  ;;  %vm46_vm6 = vcmask 392448   ;;  %vm53_vm7 = vcmask 261248  }
   0x4   :  { %s83_s22 = smov 96   ;;  %s84_s23 = smov 64   ;;  %v70_v4 = vld [vmem:[%s128_s0 + $0x3] ss:$8 sm:%s35_s20]   ;;  %v71_v5 = vld [vmem:[%s128_s0 + $0x2] ss:$8 sm:%s42_s21]  }
   0x5   :  { %s2_s26 = smov 3  ;;  %s49_s29 = smov 3 }
   0x6   :  { %16 = vrot.lane.b32.xlu0 %v67_v2, %s83_s22  ;;  %v3_v6 = vld [vmem:[%s128_s0] ss:$8 sm:%s2_s26]   ;;  %s85_s3 = smov 48   ;;  %s86_s4 = smov 32  }
   0x7   :  { %30 = vrot.lane.b32.xlu1 %v69_v3, %s84_s23  ;;  %5 = vst.msk [vmem:[#allocation0] ss:$8 sm:$0x3] %vm4_vm0, %v3_v6   ;;  %v72_v7 = vld [vmem:[%s128_s0 + $0x1] ss:$8 sm:%s49_s29]   ;;  %s87_s0 = smov 16  }
   0xa   :  { %37 = vrot.lane.b32.xlu0 %v70_v4, %s85_s3 }
   0xb   :  { %44 = vrot.lane.b32.xlu1 %v71_v5, %s86_s4 }
   0xe   :  { %51 = vrot.lane.b32.xlu0 %v72_v7, %s87_s0 }
  0x74   :  { %v10_v8 = vpop.permute.xlu0 %9  }
  0x75   :  { %12 = vst.msk [vmem:[#allocation0] ss:$8 sm:$0x3] %vm11_vm1, %v10_v8   ;;  %v24_v9 = vpop.permute.xlu1 %23  }
  0x78   :  { %v17_v10 = vpop.permute.xlu0 %16  }
  0x79   :  { %19 = vst.msk [vmem:[#allocation0] ss:$8 sm:$0x3] %vm18_vm2, %v17_v10   ;;  %v31_v11 = vpop.permute.xlu1 %30  }
  0x7a   :  { %26 = vst.msk [vmem:[#allocation0] ss:$8 sm:$0x3] %vm25_vm3, %v24_v9  }
  0x7b   :  { %33 = vst.msk [vmem:[#allocation0] ss:$8 sm:$0x3] %vm32_vm4, %v31_v11  }
  0x7c   :  { %v38_v12 = vpop.permute.xlu0 %37  }
  0x7d   :  { %40 = vst.msk [vmem:[#allocation0] ss:$8 sm:$0x3] %vm39_vm5, %v38_v12   ;;  %v45_v13 = vpop.permute.xlu1 %44  }
  0x7e   :  { %47 = vst.msk [vmem:[#allocation0] ss:$8 sm:$0x3] %vm46_vm6, %v45_v13  }
  0x80   :  { %v52_v14 = vpop.permute.xlu0 %51  }
  0x81   :  { %54 = vst.msk [vmem:[#allocation0] ss:$8 sm:$0x3] %vm53_vm7, %v52_v14  }
  0x88   :  { %v58_v15 = vld [vmem:[#allocation0] sm:$0x1]  ;;  %v62_v16 = vld [vmem:[#allocation0 + $0x8] sm:$0x1] }
  0x89   :  { %60 = vst [vmem:[%s129_s1] sm:$0x1] %v58_v15  ;;  %73 = vst [vmem:[%s129_s1 + $0x1] sm:$0x1] %v62_v16 }

// kernel: tile.13
= control target key start
LH: loop header
LB: loop body
LE: loop exit
PB: predicated region body
PF: predicated region fallthrough
CT: control target
= control target key end

     0   :  { %s28_s0 = inlined_call_operand.vmem [shape: f32[8], index: 0, kind: input, shape index: {}]   ;;  %s29_s1 = inlined_call_operand.vmem [shape: f32[16,8], index: 1, kind: output, shape index: {}]  }
   0x1   :  { %v4_v0 = vld [vmem:[%s28_s0] ss:$0 sm:$0xff] }
   0x2   :  { %5 = vst [vmem:[%s29_s1] sm:$0xff] %v4_v0  ;;  %8 = vst [vmem:[%s29_s1 + $0x8] sm:$0xff] %v4_v0 }

// kernel: tile.14
= control target key start
LH: loop header
LB: loop body
LE: loop exit
PB: predicated region body
PF: predicated region fallthrough
CT: control target
= control target key end

     0   :  { %s131_s10 = smov 120   ;;  %s132_s11 = smov 104   ;;  %vm3_vm0 = vcmask 64512   ;;  %vm9_vm1 = vcmask 1048512   ;;  %vm15_vm2 = vcmask 982912   ;;  %vm21_vm3 = vcmask 917312   ;;  %s207_s0 = inlined_call_operand.vmem [shape: f32[16,8], index: 0, kind: input, shape index: {}]   ;;  %s208_s1 = inlined_call_operand.vmem [shape: f32[1,128], index: 1, kind: output, shape index: {}]  }
   0x1   :  { %v101_v0 = vld [vmem:[%s207_s0 + $0xf] sm:$0x1]   ;;  %v103_v1 = vld [vmem:[%s207_s0 + $0xd] sm:$0x1]   ;;  %v102_v2 = vld [vmem:[%s207_s0 + $0xe] sm:$0x1]  }
   0x2   :  { %7 = vrot.lane.b32.xlu0 %v101_v0, %s131_s10  ;;  %19 = vrot.lane.b32.xlu1 %v103_v1, %s132_s11  ;;  %v104_v3 = vld [vmem:[%s207_s0 + $0xc] sm:$0x1]   ;;  %s133_s16 = smov 112   ;;  %s134_s17 = smov 96   ;;  %v105_v4 = vld [vmem:[%s207_s0 + $0xb] sm:$0x1]  }
   0x3   :  { %v106_v5 = vld [vmem:[%s207_s0 + $0xa] sm:$0x1]   ;;  %v2_v6 = vld [vmem:[%s207_s0] sm:$0x1]   ;;  %s135_s24 = smov 88   ;;  %s136_s25 = smov 80  }
   0x4   :  { %4 = vst.msk [vmem:[#allocation0] sm:$0x1] %vm3_vm0, %v2_v6   ;;  %v107_v7 = vld [vmem:[%s207_s0 + $0x9] sm:$0x1]   ;;  %v108_v8 = vld [vmem:[%s207_s0 + $0x8] sm:$0x1]  }
   0x5   :  { %s137_s30 = smov 72   ;;  %s138_s2 = smov 64   ;;  %v109_v9 = vld [vmem:[%s207_s0 + $0x7] sm:$0x1]   ;;  %v110_v10 = vld [vmem:[%s207_s0 + $0x6] sm:$0x1]  }
   0x6   :  { %13 = vrot.lane.b32.xlu0 %v102_v2, %s133_s16  ;;  %25 = vrot.lane.b32.xlu1 %v104_v3, %s134_s17  ;;  %s139_s7 = smov 56   ;;  %s140_s8 = smov 48   ;;  %v111_v11 = vld [vmem:[%s207_s0 + $0x5] sm:$0x1]   ;;  %v112_v12 = vld [vmem:[%s207_s0 + $0x4] sm:$0x1]  }
   0x7   :  { %s141_s13 = smov 40   ;;  %s142_s14 = smov 32   ;;  %v113_v13 = vld [vmem:[%s207_s0 + $0x3] sm:$0x1]   ;;  %v114_v14 = vld [vmem:[%s207_s0 + $0x2] sm:$0x1]  }
   0x8   :  { %s143_s19 = smov 24   ;;  %s144_s20 = smov 16   ;;  %v115_v15 = vld [vmem:[%s207_s0 + $0x1] sm:$0x1]   ;;  %vm27_vm4 = vcmask 851712   ;;  %vm33_vm5 = vcmask 786112  }
   0x9   :  { %s145_s0 = smov 8   ;;  %vm39_vm6 = vcmask 720512   ;;  %vm45_vm7 = vcmask 654912   ;;  %vm51_vm8 = vcmask 589312   ;;  %vm57_vm9 = vcmask 523712  }
   0xa   :  { %31 = vrot.lane.b32.xlu0 %v105_v4, %s135_s24  ;;  %37 = vrot.lane.b32.xlu1 %v106_v5, %s136_s25  ;;  %vm63_vm10 = vcmask 458112   ;;  %vm69_vm11 = vcmask 392512   ;;  %vm75_vm12 = vcmask 326912   ;;  %vm81_vm13 = vcmask 261312  }
   0xb   :  { %vm87_vm14 = vcmask 195712   ;;  %vm93_vm15 = vcmask 130112  }
   0xe   :  { %43 = vrot.lane.b32.xlu0 %v107_v7, %s137_s30  ;;  %49 = vrot.lane.b32.xlu1 %v108_v8, %s138_s2 }
  0x12   :  { %55 = vrot.lane.b32.xlu0 %v109_v9, %s139_s7  ;;  %61 = vrot.lane.b32.xlu1 %v110_v10, %s140_s8 }
  0x16   :  { %67 = vrot.lane.b32.xlu0 %v111_v11, %s141_s13  ;;  %73 = vrot.lane.b32.xlu1 %v112_v12, %s142_s14 }
  0x1a   :  { %79 = vrot.lane.b32.xlu0 %v113_v13, %s143_s19  ;;  %85 = vrot.lane.b32.xlu1 %v114_v14, %s144_s20 }
  0x1e   :  { %91 = vrot.lane.b32.xlu0 %v115_v15, %s145_s0 }
  0x74   :  { %v8_v16 = vpop.permute.xlu0 %7   ;;  %v20_v17 = vpop.permute.xlu1 %19  }
  0x75   :  { %10 = vst.msk [vmem:[#allocation0] sm:$0x1] %vm9_vm1, %v8_v16  }
  0x78   :  { %v14_v18 = vpop.permute.xlu0 %13   ;;  %v26_v19 = vpop.permute.xlu1 %25  }
  0x79   :  { %16 = vst.msk [vmem:[#allocation0] sm:$0x1] %vm15_vm2, %v14_v18  }
  0x7a   :  { %22 = vst.msk [vmem:[#allocation0] sm:$0x1] %vm21_vm3, %v20_v17  }
  0x7b   :  { %28 = vst.msk [vmem:[#allocation0] sm:$0x1] %vm27_vm4, %v26_v19  }
  0x7c   :  { %v32_v20 = vpop.permute.xlu0 %31   ;;  %v38_v21 = vpop.permute.xlu1 %37  }
  0x7d   :  { %34 = vst.msk [vmem:[#allocation0] sm:$0x1] %vm33_vm5, %v32_v20  }
  0x7e   :  { %40 = vst.msk [vmem:[#allocation0] sm:$0x1] %vm39_vm6, %v38_v21  }
  0x80   :  { %v44_v22 = vpop.permute.xlu0 %43   ;;  %v50_v23 = vpop.permute.xlu1 %49  }
  0x81   :  { %46 = vst.msk [vmem:[#allocation0] sm:$0x1] %vm45_vm7, %v44_v22  }
  0x82   :  { %52 = vst.msk [vmem:[#allocation0] sm:$0x1] %vm51_vm8, %v50_v23  }
  0x84   :  { %v56_v24 = vpop.permute.xlu0 %55   ;;  %v62_v25 = vpop.permute.xlu1 %61  }
  0x85   :  { %58 = vst.msk [vmem:[#allocation0] sm:$0x1] %vm57_vm9, %v56_v24  }
  0x86   :  { %64 = vst.msk [vmem:[#allocation0] sm:$0x1] %vm63_vm10, %v62_v25  }
  0x88   :  { %v68_v26 = vpop.permute.xlu0 %67   ;;  %v74_v27 = vpop.permute.xlu1 %73  }
  0x89   :  { %70 = vst.msk [vmem:[#allocation0] sm:$0x1] %vm69_vm11, %v68_v26  }
  0x8a   :  { %76 = vst.msk [vmem:[#allocation0] sm:$0x1] %vm75_vm12, %v74_v27  }
  0x8c   :  { %v80_v28 = vpop.permute.xlu0 %79   ;;  %v86_v29 = vpop.permute.xlu1 %85  }
  0x8d   :  { %82 = vst.msk [vmem:[#allocation0] sm:$0x1] %vm81_vm13, %v80_v28  }
  0x8e   :  { %88 = vst.msk [vmem:[#allocation0] sm:$0x1] %vm87_vm14, %v86_v29  }
  0x90   :  { %v92_v30 = vpop.permute.xlu0 %91  }
  0x91   :  { %94 = vst.msk [vmem:[#allocation0] sm:$0x1] %vm93_vm15, %v92_v30  }
  0x98   :  { %v98_v31 = vld [vmem:[#allocation0] sm:$0x1] }
  0x99   :  { %100 = vst [vmem:[%s208_s1] sm:$0x1] %v98_v31 }

// kernel: feature_extractor_forward.1
= control target key start
LH: loop header
LB: loop body
LE: loop exit
PB: predicated region body
PF: predicated region fallthrough
CT: control target
= control target key end

     0   :  { %s1433_s21 = smov 0   ;;  %s1875_s0 = inlined_call_operand.vmem [shape: f32[2,18,72], index: 0, kind: input, shape index: {}]   ;;  %s1876_s1 = inlined_call_operand.vmem [shape: f32[3,72,128], index: 1, kind: input, shape index: {}]   ;;  %s1877_s2 = inlined_call_operand.vmem [shape: f32[1,128], index: 2, kind: input, shape index: {}]   ;;  %s1878_s3 = inlined_call_operand.vmem [shape: f32[3,128,256], index: 3, kind: input, shape index: {}]   ;;  %s1879_s4 = inlined_call_operand.vmem [shape: f32[1,256], index: 4, kind: input, shape index: {}]   ;;  %s1880_s5 = inlined_call_operand.vmem [shape: f32[2,16,128], index: 5, kind: output, shape index: {0}]   ;;  %s1881_s6 = inlined_call_operand.vmem [shape: f32[2,16,256], index: 6, kind: output, shape index: {1}]  }
   0x1 LB: > { %s1021_s22 = sadd.s32 4294967295, %s1395_s21   ;;  %p1025_p0 = scmp.ge.s32.totalorder %s1395_s21, 1  ;;  %s1395_s21 = sphi %s1433_s21, %s17_s21  }
   0x2   : > { %p215_p1 = scmp.lt.s32.totalorder %s1395_s21, 3 }
   0x4   : > { %p216_p2 = pnand %p1025_p0, %p215_p1 }
   0x5   : > { %v268_v0 = vld [vmem:[%s1876_s1] sm:$0xff] (!%p216_p2)  ;;  %v269_v1 = vld [vmem:[%s1876_s1 + $0x8] sm:$0xff] (!%p216_p2)  ;;  %v270_v2 = vld [vmem:[%s1876_s1 + $0x10] sm:$0xff] (!%p216_p2)  ;;  %p250_p3 = scmp.lt.s32.totalorder (!%p216_p2), %s1021_s22, 1  ;;  %vm296_vm0 = vcmask (!%p216_p2), 588800   ;;  %vm290_vm1 = vcmask (!%p216_p2), 1046528  }
   0x6   : > { %219 = sbr.rel (%p216_p2) target bundleno = 519 (0x207), region = 40  ;;  %v1239_v3 = vpack.c.bf16 (!%p216_p2), %v269_v1, %v268_v0  ;;  %v271_v4 = vld [vmem:[%s1876_s1 + $0x18] sm:$0xff] (!%p216_p2)  ;;  %v272_v6 = vld [vmem:[%s1876_s1 + $0x20] sm:$0xff] (!%p216_p2)  ;;  %v273_v7 = vld [vmem:[%s1876_s1 + $0x28] sm:$0xff] (!%p216_p2)  ;;  %vm465_vm2 = vcmask (!%p216_p2), 1045504   ;;  %vm567_vm3 = vcmask (!%p216_p2), 1040384  }
   0x7   : > { %v1243_v5 = vpack.c.bf16 (!%p216_p2), %v271_v4, %v270_v2  ;;  %v1031_v8 = vld [vmem:[%s1876_s1 + $0x48] sm:$0xff] (!%p216_p2)  ;;  %v1032_v9 = vld [vmem:[%s1876_s1 + $0x50] sm:$0xff] (!%p216_p2)  ;;  %v1033_v11 = vld [vmem:[%s1876_s1 + $0x58] sm:$0xff] (!%p216_p2)  ;;  %v1247_v13 = vpack.c.bf16 (!%p216_p2), %v273_v7, %v272_v6 }
   0x8   : > { %1240 = vmatprep.subr.bf16.mxu0 (!%p216_p2), %v1239_v3  ;;  %v1223_v10 = vpack.c.bf16 (!%p216_p2), %v1032_v9, %v1031_v8  ;;  %v1034_v12 = vld [vmem:[%s1876_s1 + $0x60] sm:$0xff] (!%p216_p2)  ;;  %v1035_v15 = vld [vmem:[%s1876_s1 + $0x68] sm:$0xff] (!%p216_p2)  ;;  %v274_v16 = vld [vmem:[%s1876_s1 + $0x30] sm:$0xff] (!%p216_p2) }
   0x9   : > { %1242 = vmatpush3.bf16.msra.mxu0 (!%p216_p2), %v1239_v3  ;;  %v1227_v14 = vpack.c.bf16 (!%p216_p2), %v1034_v12, %v1033_v11  ;;  %v275_v17 = vld [vmem:[%s1876_s1 + $0x38] sm:$0xff] (!%p216_p2)  ;;  %v1036_v18 = vld [vmem:[%s1876_s1 + $0x70] sm:$0xff] (!%p216_p2)  ;;  %v1038_v25 = vld [vmem:[%s1876_s1 + $0x80] sm:$0xff] (!%p216_p2) }
   0xa   : > { %1244 = vmatprep.subr.bf16.mxu0 (!%p216_p2), %v1243_v5  ;;  %1224 = vmatprep.subr.bf16.mxu1 (!%p216_p2), %v1223_v10  ;;  %v1231_v22 = vpack.c.bf16 (!%p216_p2), %v1036_v18, %v1035_v15  ;;  %v1251_v23 = vpack.c.bf16 (!%p216_p2), %v275_v17, %v274_v16  ;;  %v1037_v24 = vld [vmem:[%s1876_s1 + $0x78] sm:$0xff] (!%p216_p2)  ;;  %v276_v29 = vld [vmem:[%s1876_s1 + $0x40] sm:$0xff] (!%p216_p2)  ;;  %v1044_v31 = vld [vmem:[%s1876_s1 + $0x90] sm:$0xff] (!%p216_p2) }
   0xb   : > { %1226 = vmatpush3.bf16.msra.mxu1 (!%p216_p2), %v1223_v10  ;;  %v1235_v28 = vpack.c.bf16 (!%p216_p2), %v1038_v25, %v1037_v24  ;;  %v1045_v32 = vld [vmem:[%s1876_s1 + $0x98] sm:$0xff] (!%p216_p2)  ;;  %v1046_v35 = vld [vmem:[%s1876_s1 + $0xa0] sm:$0xff] (!%p216_p2)  ;;  %v1047_v36 = vld [vmem:[%s1876_s1 + $0xa8] sm:$0xff] (!%p216_p2) }
   0xc   : > { %1228 = vmatprep.subr.bf16.mxu1 (!%p216_p2), %v1227_v14  ;;  %v1255_v38 = vpack.c.bf16 (!%p216_p2), %v1045_v32, %v1044_v31  ;;  %v1039_v39 = vld [vmem:[%s1876_s1 + $0x88] sm:$0xff] (!%p216_p2)  ;;  %v583_v41 = vld [vmem:[%s1878_s3 + $0x18] sm:$0xff] (!%p216_p2)  ;;  %v580_v42 = vld [vmem:[%s1878_s3] sm:$0xff] (!%p216_p2)  ;;  %v1259_v44 = vpack.c.bf16 (!%p216_p2), %v1047_v36, %v1046_v35 }
   0xd   : > { %s1883_s22 = smov (!%p250_p3, %s1021_s22), 1  ;;  %1246 = vmatpush3.bf16.msra.mxu0 %v1243_v5  ;;  %v581_v40 = vld [vmem:[%s1878_s3 + $0x8] sm:$0xff]  ;;  %v582_v43 = vld [vmem:[%s1878_s3 + $0x10] sm:$0xff]  ;;  %v587_v47 = vld [vmem:[%s1878_s3 + $0x38] sm:$0xff] }
   0xe   : > { %s1379_s15 = smul.u32 24, %s1883_s22  ;;  %1248 = vmatprep.subr.bf16.mxu0 %v1247_v13  ;;  %v585_v46 = vld [vmem:[%s1878_s3 + $0x28] sm:$0xff]  ;;  %v1048_v48 = vld [vmem:[%s1876_s1 + $0xb0] sm:$0xff]  ;;  %v1049_v49 = vld [vmem:[%s1876_s1 + $0xb8] sm:$0xff]  ;;  %v1303_v50 = vpack.c.bf16 %v583_v41, %v581_v40  ;;  %v1305_v52 = vpack.c.bf16 %v582_v43, %v580_v42  ;;  %s1125_s13 = sshll.u32 %s1883_s22, 4 }
   0xf   : > { %1230 = vmatpush3.bf16.msra.mxu1 %v1227_v14  ;;  %v1307_v53 = vpack.c.bf16 %v587_v47, %v585_v46  ;;  %v584_v54 = vld [vmem:[%s1878_s3 + $0x20] sm:$0xff]  ;;  %v586_v55 = vld [vmem:[%s1878_s3 + $0x30] sm:$0xff]  ;;  %v1263_v56 = vpack.c.bf16 %v1049_v49, %v1048_v48  ;;  %v589_v57 = vld [vmem:[%s1878_s3 + $0x48] sm:$0xff]  ;;  %s259_s18 = scalar_lea.vmem %s1880_s5, %s1125_s13 }
  0x10   : > { %s254_s30 = scalar_lea.vmem %s1875_s0, %s1379_s15  ;;  %1232 = vmatprep.subr.bf16.mxu1 %v1231_v22  ;;  %v591_v58 = vld [vmem:[%s1878_s3 + $0x58] sm:$0xff]  ;;  %v1050_v59 = vld [vmem:[%s1876_s1 + $0xc0] sm:$0xff]  ;;  %v1051_v60 = vld [vmem:[%s1876_s1 + $0xc8] sm:$0xff]  ;;  %v1309_v61 = vpack.c.bf16 %v586_v55, %v584_v54  ;;  %s1126_s15 = sshll.u32 %s1883_s22, 5 }
  0x11   : > { %v265_v19 = vld [vmem:[%s254_s30] sm:$0xff]  ;;  %v1490_v21 = vld [vmem:[%s254_s30 + $0x8] sm:$0xff]  ;;  %1250 = vmatpush3.bf16.msra.mxu0 %v1247_v13  ;;  %v1504_v30 = vld [vmem:[%s254_s30 + $0x10] sm:$0x3]  ;;  %v1311_v62 = vpack.c.bf16 %v591_v58, %v589_v57  ;;  %v1267_v1 = vpack.c.bf16 %v1051_v60, %v1050_v59 }
  0x12   : > { %v291_v20 = vrot.slane %v265_v19, 1  ;;  %1199 = vmatprep.mubr.msk.f32.mxu0 %vm296_vm0, %v265_v19  ;;  %v292_v26 = vrot.slane %v1490_v21, 1  ;;  %1252 = vmatprep.subr.bf16.mxu0 %v1251_v23  ;;  %v466_v33 = vrot.slane %v265_v19, 2  ;;  %v467_v34 = vrot.slane %v1490_v21, 2  ;;  %v588_v63 = vld [vmem:[%s1878_s3 + $0x40] sm:$0xff]  ;;  %v590_v0 = vld [vmem:[%s1878_s3 + $0x50] sm:$0xff]  ;;  %vm1088_vm4 = vmneg %vm567_vm3 }
  0x13   : > { %1234 = vmatpush3.bf16.msra.mxu1 %v1231_v22  ;;  %v294_v37 = vrot.slane %v1504_v30, 1  ;;  %v593_v2 = vld [vmem:[%s1878_s3 + $0x68] sm:$0xff]  ;;  %v595_v3 = vld [vmem:[%s1878_s3 + $0x78] sm:$0xff]  ;;  %v1313_v4 = vpack.c.bf16 %v590_v0, %v588_v63  ;;  %v592_v6 = vld [vmem:[%s1878_s3 + $0x60] sm:$0xff]  ;;  %v469_v10 = vrot.slane %v1504_v30, 2 }
  0x14   : > { %v293_v27 = vsel %vm290_vm1, %v291_v20, %v292_v26  ;;  %1236 = vmatprep.subr.bf16.mxu1 %v1235_v28  ;;  %v468_v45 = vsel %vm465_vm2, %v466_v33, %v467_v34  ;;  %v1315_v5 = vpack.c.bf16 %v595_v3, %v593_v2  ;;  %v594_v7 = vld [vmem:[%s1878_s3 + $0x70] sm:$0xff]  ;;  %v597_v8 = vld [vmem:[%s1878_s3 + $0x88] sm:$0xff]  ;;  %v599_v9 = vld [vmem:[%s1878_s3 + $0x98] sm:$0xff] }
  0x15   : > { %1178 = vmatprep.mubr.msk.f32.mxu1 %vm296_vm0, %v293_v27  ;;  %1254 = vmatpush3.bf16.msra.mxu0 %v1251_v23  ;;  %v295_v51 = vsel %vm290_vm1, %v292_v26, %v294_v37  ;;  %v1052_v11 = vld [vmem:[%s1876_s1 + $0xd0] sm:$0xff]  ;;  %v1057_v12 = vld [vmem:[%s1878_s3 + $0x108] sm:$0xff]  ;;  %v1059_v13 = vld [vmem:[%s1878_s3 + $0x118] sm:$0xff]  ;;  %v1317_v17 = vpack.c.bf16 %v594_v7, %v592_v6  ;;  %v1319_v19 = vpack.c.bf16 %v599_v9, %v597_v8 }
  0x16   : > { %1197 = vmatprep.subr.mxu0 %v276_v29  ;;  %v1056_v14 = vld [vmem:[%s1878_s3 + $0x100] sm:$0xff]  ;;  %v1058_v15 = vld [vmem:[%s1878_s3 + $0x110] sm:$0xff]  ;;  %v1061_v16 = vld [vmem:[%s1878_s3 + $0x128] sm:$0xff]  ;;  %v1271_v23 = vpack.c.bf16 %v1059_v13, %v1057_v12  ;;  %v470_v26 = vsel %vm465_vm2, %v467_v34, %v469_v10 }
  0x17   : > { %1238 = vmatpush3.bf16.msra.mxu1 %v1235_v28  ;;  %v1063_v18 = vld [vmem:[%s1878_s3 + $0x138] sm:$0xff]  ;;  %v596_v20 = vld [vmem:[%s1878_s3 + $0x80] sm:$0xff]  ;;  %v598_v22 = vld [vmem:[%s1878_s3 + $0x90] sm:$0xff]  ;;  %v1273_v27 = vpack.c.bf16 %v1058_v15, %v1056_v14 }
  0x18   : > { %1176 = vmatprep.subr.mxu1 %v1039_v39  ;;  %v601_v24 = vld [vmem:[%s1878_s3 + $0xa8] sm:$0xff]  ;;  %v603_v25 = vld [vmem:[%s1878_s3 + $0xb8] sm:$0xff]  ;;  %v1275_v28 = vpack.c.bf16 %v1063_v18, %v1061_v16  ;;  %v1062_v30 = vld [vmem:[%s1878_s3 + $0x130] sm:$0xff]  ;;  %v1321_v32 = vpack.c.bf16 %v598_v22, %v596_v20 }
  0x19   : > { %1198 = vmatpush3.msra.mxu0 %v276_v29  ;;  %v1060_v29 = vld [vmem:[%s1878_s3 + $0x120] sm:$0xff]  ;;  %v1065_v31 = vld [vmem:[%s1878_s3 + $0x148] sm:$0xff]  ;;  %v1323_v33 = vpack.c.bf16 %v603_v25, %v601_v24  ;;  %v602_v35 = vld [vmem:[%s1878_s3 + $0xb0] sm:$0xff] }
  0x1a   : > { %1256 = vmatprep.subr.bf16.mxu0 %v1255_v38  ;;  %1200 = vmatmul.mubr.msk.f32.vlgmr.msra.gmra.mrb[0].mxu0 %vm296_vm0, %v1490_v21  ;;  %v1067_v21 = vld [vmem:[%s1878_s3 + $0x158] sm:$0xff]  ;;  %v600_v34 = vld [vmem:[%s1878_s3 + $0xa0] sm:$0xff]  ;;  %v1277_v36 = vpack.c.bf16 %v1062_v30, %v1060_v29  ;;  %v1069_v41 = vld [vmem:[%s1878_s3 + $0x168] sm:$0xff] }
  0x1b   : > { %1258 = vmatpush3.bf16.msra.mxu0 %v1255_v38  ;;  %1220 = vmatprep.mubr.msk.f32.mxu0 %vm296_vm0, %v468_v45  ;;  %v1279_v37 = vpack.c.bf16 %v1067_v21, %v1065_v31  ;;  %v1064_v38 = vld [vmem:[%s1878_s3 + $0x140] sm:$0xff]  ;;  %v1325_v40 = vpack.c.bf16 %v602_v35, %v600_v34  ;;  %v1071_v42 = vld [vmem:[%s1878_s3 + $0x178] sm:$0xff]  ;;  %v1070_v46 = vld [vmem:[%s1878_s3 + $0x170] sm:$0xff] }
  0x1c   : > { %1260 = vmatprep.subr.bf16.mxu0 %v1259_v44  ;;  %1177 = vmatpush3.msra.mxu1 %v1039_v39  ;;  %v1066_v39 = vld [vmem:[%s1878_s3 + $0x150] sm:$0xff]  ;;  %v1068_v45 = vld [vmem:[%s1878_s3 + $0x160] sm:$0xff]  ;;  %v1073_v47 = vld [vmem:[%s1878_s3 + $0x188] sm:$0xff] }
  0x1d   : > { %1179 = vmatmul.mubr.msk.f32.vlgmr.msra.gmra.mrb[0].mxu1 %vm296_vm0, %v295_v51  ;;  %1304 = vmatprep.subr.bf16.mxu1 %v1303_v50  ;;  %v1281_v43 = vpack.c.bf16 %v1066_v39, %v1064_v38  ;;  %v1075_v48 = vld [vmem:[%s1878_s3 + $0x198] sm:$0xff]  ;;  %v1285_v49 = vpack.c.bf16 %v1070_v46, %v1068_v45  ;;  %v1072_v51 = vld [vmem:[%s1878_s3 + $0x180] sm:$0xff]  ;;  %v1078_v58 = vld [vmem:[%s1878_s3 + $0x1b0] sm:$0xff] }
  0x1e   : > { %1306 = vmatpush1.bf16.msra.mxu1 %v1305_v52  ;;  %v1287_v50 = vpack.c.bf16 %v1075_v48, %v1073_v47  ;;  %v1074_v52 = vld [vmem:[%s1878_s3 + $0x190] sm:$0xff]  ;;  %v1079_v54 = vld [vmem:[%s1878_s3 + $0x1b8] sm:$0xff]  ;;  %v1076_v57 = vld [vmem:[%s1878_s3 + $0x1a0] sm:$0xff] }
  0x1f   : > { %1262 = vmatpush3.bf16.msra.mxu0 %v1259_v44  ;;  %1308 = vmatprep.subr.bf16.mxu1 %v1307_v53  ;;  %v1283_v44 = vpack.c.bf16 %v1071_v42, %v1069_v41  ;;  %v1077_v53 = vld [vmem:[%s1878_s3 + $0x1a8] sm:$0xff]  ;;  %v1289_v55 = vpack.c.bf16 %v1074_v52, %v1072_v51  ;;  %v1293_v59 = vpack.c.bf16 %v1078_v58, %v1076_v57  ;;  %v1080_v63 = vld [vmem:[%s1878_s3 + $0x1c0] sm:$0xff]  ;;  %v1082_v0 = vld [vmem:[%s1878_s3 + $0x1d0] sm:$0xff] }
  0x20   : > { %1264 = vmatprep.subr.bf16.mxu0 %v1263_v56  ;;  %v1081_v60 = vld [vmem:[%s1878_s3 + $0x1c8] sm:$0xff]  ;;  %v1297_v2 = vpack.c.bf16 %v1082_v0, %v1080_v63  ;;  %v607_v3 = vld [vmem:[%s1878_s3 + $0xd8] sm:$0xff]  ;;  %v1086_v12 = vld [vmem:[%s1878_s3 + $0x1f0] sm:$0xff] }
  0x21   : > { %v1085_v8 = vld [vmem:[%s1878_s3 + $0x1e8] sm:$0xff]  ;;  %v1087_v9 = vld [vmem:[%s1878_s3 + $0x1f8] sm:$0xff]  ;;  %v608_v16 = vld [vmem:[%s1878_s3 + $0xe0] sm:$0xff] }
  0x22   : > { %1310 = vmatpush1.bf16.msra.mxu1 %v1309_v61  ;;  %v1083_v61 = vld [vmem:[%s1878_s3 + $0x1d8] sm:$0xff]  ;;  %v1299_v10 = vpack.c.bf16 %v1087_v9, %v1085_v8  ;;  %v609_v13 = vld [vmem:[%s1878_s3 + $0xe8] sm:$0xff]  ;;  %v1092_v34 = vld [vmem:[%s1878_s3 + $0x210] sm:$0xff] }
  0x23   : > { %1266 = vmatpush3.bf16.msra.mxu0 %v1263_v56  ;;  %1312 = vmatprep.subr.bf16.mxu1 %v1311_v62  ;;  %v1291_v56 = vpack.c.bf16 %v1079_v54, %v1077_v53  ;;  %v1295_v62 = vpack.c.bf16 %v1083_v61, %v1081_v60  ;;  %v611_v15 = vld [vmem:[%s1878_s3 + $0xf8] sm:$0xff]  ;;  %v1091_v20 = vld [vmem:[%s1878_s3 + $0x208] sm:$0xff]  ;;  %v1094_v45 = vld [vmem:[%s1878_s3 + $0x220] sm:$0xff] }
  0x24   : > { %1268 = vmatprep.subr.bf16.mxu0 %v1267_v1  ;;  %v1331_v18 = vpack.c.bf16 %v611_v15, %v609_v13  ;;  %v1093_v22 = vld [vmem:[%s1878_s3 + $0x218] sm:$0xff]  ;;  %v1096_v46 = vld [vmem:[%s1878_s3 + $0x230] sm:$0xff]  ;;  %v1099_v47 = vld [vmem:[%s1878_s3 + $0x248] sm:$0xff] }
  0x25   : > { %v1335_v24 = vpack.c.bf16 %v1093_v22, %v1091_v20  ;;  %v1101_v48 = vld [vmem:[%s1878_s3 + $0x258] sm:$0xff]  ;;  %v1341_v51 = vpack.c.bf16 %v1096_v46, %v1094_v45  ;;  %v1098_v53 = vld [vmem:[%s1878_s3 + $0x240] sm:$0xff]  ;;  %v1100_v54 = vld [vmem:[%s1878_s3 + $0x250] sm:$0xff] }
  0x26   : > { %1314 = vmatpush1.bf16.msra.mxu1 %v1313_v4  ;;  %v604_v4 = vld [vmem:[%s1878_s3 + $0xc0] sm:$0xff]  ;;  %v1343_v52 = vpack.c.bf16 %v1101_v48, %v1099_v47  ;;  %v1345_v57 = vpack.c.bf16 %v1100_v54, %v1098_v53  ;;  %v1104_v60 = vld [vmem:[%s1878_s3 + $0x270] sm:$0xff]  ;;  %v1107_v61 = vld [vmem:[%s1878_s3 + $0x288] sm:$0xff] }
  0x27   : > { %1270 = vmatpush3.bf16.msra.mxu0 %v1267_v1  ;;  %1316 = vmatprep.subr.bf16.mxu1 %v1315_v5  ;;  %v605_v1 = vld [vmem:[%s1878_s3 + $0xc8] sm:$0xff]  ;;  %v606_v5 = vld [vmem:[%s1878_s3 + $0xd0] sm:$0xff]  ;;  %v1114_v13 = vld [vmem:[%s1878_s3 + $0x2c0] sm:$0xff] }
  0x28   : > { %1218 = vmatprep.subr.mxu0 %v1052_v11  ;;  %v1327_v6 = vpack.c.bf16 %v607_v3, %v605_v1  ;;  %v1329_v7 = vpack.c.bf16 %v606_v5, %v604_v4  ;;  %v1106_v1 = vld [vmem:[%s1878_s3 + $0x280] sm:$0xff]  ;;  %v1111_v3 = vld [vmem:[%s1878_s3 + $0x2a8] sm:$0xff]  ;;  %v1113_v4 = vld [vmem:[%s1878_s3 + $0x2b8] sm:$0xff] }
  0x29   : > { %v1112_v8 = vld [vmem:[%s1878_s3 + $0x2b0] sm:$0xff]  ;;  %v1115_v9 = vld [vmem:[%s1878_s3 + $0x2c8] sm:$0xff] }
  0x2a   : > { %1318 = vmatpush1.bf16.msra.mxu1 %v1317_v17  ;;  %v610_v17 = vld [vmem:[%s1878_s3 + $0xf0] sm:$0xff]  ;;  %v1119_v15 = vld [vmem:[%s1878_s3 + $0x2e8] sm:$0xff] }
  0x2b   : > { %1219 = vmatpush3.msra.mxu0 %v1052_v11  ;;  %1320 = vmatprep.subr.bf16.mxu1 %v1319_v19  ;;  %v1084_v11 = vld [vmem:[%s1878_s3 + $0x1e0] sm:$0xff]  ;;  %v1333_v19 = vpack.c.bf16 %v610_v17, %v608_v16  ;;  %v1121_v16 = vld [vmem:[%s1878_s3 + $0x2f8] sm:$0xff]  ;;  %v1120_v20 = vld [vmem:[%s1878_s3 + $0x2f0] sm:$0xff] }
  0x2c   : > { %1221 = vmatmul.mubr.msk.f32.vlgmr.msra.gmra.mrb[0].mxu0 %vm296_vm0, %v470_v26  ;;  %1272 = vmatprep.subr.bf16.mxu0 %v1271_v23  ;;  %v1301_v14 = vpack.c.bf16 %v1086_v12, %v1084_v11  ;;  %v1397_v23 = vmov 0.0  }
  0x2d   : > { %1274 = vmatpush1.bf16.msra.mxu0 %v1273_v27  ;;  %709 = vmatprep.mubr.f32.mxu0 %v1397_v23 }
  0x2e   : > { %1276 = vmatprep.subr.bf16.mxu0 %v1275_v28  ;;  %1322 = vmatpush1.bf16.msra.mxu1 %v1321_v32  ;;  %v1055_v28 = vld [vmem:[%s1877_s2] ss:$0 sm:$0xff] }
  0x2f   : > { %1324 = vmatprep.subr.bf16.mxu1 %v1323_v33  ;;  %786 = vmatprep.mubr.f32.mxu1 %v1397_v23  ;;  %v1090_v33 = vld [vmem:[%s1878_s3 + $0x200] sm:$0xff] }
  0x30   : > { %v1337_v39 = vpack.c.bf16 %v1092_v34, %v1090_v33 }
  0x31   : > { %1278 = vmatpush1.bf16.msra.mxu0 %v1277_v36  ;;  %v1095_v36 = vld [vmem:[%s1878_s3 + $0x228] sm:$0xff] }
  0x32   : > { %1280 = vmatprep.subr.bf16.mxu0 %v1279_v37  ;;  %1326 = vmatpush1.bf16.msra.mxu1 %v1325_v40  ;;  %v1097_v37 = vld [vmem:[%s1878_s3 + $0x238] sm:$0xff] }
  0x33   : > { %1328 = vmatprep.subr.bf16.mxu1 %v1327_v6  ;;  %v1355_v6 = vpack.c.bf16 %v1113_v4, %v1111_v3 }
  0x35   : > { %1282 = vmatpush1.bf16.msra.mxu0 %v1281_v43 }
  0x36   : > { %1284 = vmatprep.subr.bf16.mxu0 %v1283_v44  ;;  %1330 = vmatpush1.bf16.msra.mxu1 %v1329_v7  ;;  %v1339_v44 = vpack.c.bf16 %v1097_v37, %v1095_v36  ;;  %v1110_v7 = vld [vmem:[%s1878_s3 + $0x2a0] sm:$0xff] }
  0x37   : > { %1332 = vmatprep.subr.bf16.mxu1 %v1331_v18  ;;  %v1357_v11 = vpack.c.bf16 %v1112_v8, %v1110_v7  ;;  %v1363_v18 = vpack.c.bf16 %v1121_v16, %v1119_v15 }
  0x39   : > { %1286 = vmatpush1.bf16.msra.mxu0 %v1285_v49 }
  0x3a   : > { %1288 = vmatprep.subr.bf16.mxu0 %v1287_v50  ;;  %1334 = vmatpush1.bf16.msra.mxu1 %v1333_v19  ;;  %v1118_v19 = vld [vmem:[%s1878_s3 + $0x2e0] sm:$0xff] }
  0x3b   : > { %1336 = vmatprep.subr.bf16.mxu1 %v1335_v24  ;;  %v1365_v22 = vpack.c.bf16 %v1120_v20, %v1118_v19 }
  0x3d   : > { %1290 = vmatpush1.bf16.msra.mxu0 %v1289_v55  ;;  %v1103_v55 = vld [vmem:[%s1878_s3 + $0x268] sm:$0xff] }
  0x3e   : > { %1292 = vmatprep.subr.bf16.mxu0 %v1291_v56  ;;  %v1105_v56 = vld [vmem:[%s1878_s3 + $0x278] sm:$0xff] }
  0x3f   : > { %v1347_v58 = vpack.c.bf16 %v1105_v56, %v1103_v55 }
  0x41   : > { %1294 = vmatpush1.bf16.msra.mxu0 %v1293_v59  ;;  %v1102_v59 = vld [vmem:[%s1878_s3 + $0x260] sm:$0xff] }
  0x42   : > { %1296 = vmatprep.subr.bf16.mxu0 %v1295_v62  ;;  %v1109_v62 = vld [vmem:[%s1878_s3 + $0x298] sm:$0xff]  ;;  %v1349_v63 = vpack.c.bf16 %v1104_v60, %v1102_v59 }
  0x43   : > { %v1351_v0 = vpack.c.bf16 %v1109_v62, %v1107_v61 }
  0x45   : > { %1298 = vmatpush1.bf16.msra.mxu0 %v1297_v2  ;;  %v1108_v2 = vld [vmem:[%s1878_s3 + $0x290] sm:$0xff] }
  0x46   : > { %1300 = vmatprep.subr.bf16.mxu0 %v1299_v10  ;;  %v1353_v5 = vpack.c.bf16 %v1108_v2, %v1106_v1  ;;  %v1117_v10 = vld [vmem:[%s1878_s3 + $0x2d8] sm:$0xff] }
  0x47   : > { %v1359_v12 = vpack.c.bf16 %v1117_v10, %v1115_v9 }
  0x49   : > { %1302 = vmatpush1.bf16.msra.mxu0 %v1301_v14  ;;  %v1116_v14 = vld [vmem:[%s1878_s3 + $0x2d0] sm:$0xff] }
  0x4a   : > { %v1361_v17 = vpack.c.bf16 %v1116_v14, %v1114_v13 }
  0xf0   : > { %v1180_v25 = vpop.f32.mrb[0].mxu1 }
  0xf1   : > { %v367_v26 = vpop.f32.mrb[1].mxu1 }
  0xff   : > { %v1222_v27 = vpop.f32.mrb[0].mxu0 }
 0x100   : > { %v1367_v29 = vadd.f32 %v1222_v27, %v1180_v25  ;;  %v541_v30 = vpop.f32.mrb[1].mxu0 }
 0x101   : > { %v1368_v31 = vadd.f32 %v541_v30, %v367_v26 }
 0x102   : > { %v560_v32 = vadd.f32 %v1367_v29, %v1055_v28 }
 0x103   : > { %v559_v21 = vadd.f32 %v1368_v31, %v1055_v28  ;;  %v915_v28 = vlaneseq  ;;  %v913_v31 = vld [vmem:[%s1879_s4] sm:$0x3] }
 0x104   : > { %562 = vst [vmem:[%s259_s18 + $0x8] sm:$0xff] %v560_v32  ;;  %v1764_v35 = vmax.f32 %v560_v32, 0.0 }
 0x105   : > { %561 = vst [vmem:[%s259_s18] sm:$0xff] %v559_v21  ;;  %v563_v38 = vmax.f32 %v559_v21, 0.0  ;;  %v916_v29 = vshrl.u32 %v915_v28, 7  ;;  %s264_s18 = scalar_lea.vmem %s1881_s6, %s1126_s15 }
 0x106   : > { %v575_v40 = vrot.slane %v1764_v35, 1  ;;  %v569_v41 = vrot.slane %v1764_v35, 7 }
 0x107   : > { %v568_v42 = vrot.slane %v563_v38, 7  ;;  %v574_v43 = vrot.slane %v563_v38, 1  ;;  %710 = vmatmul.mubr.f32.vlgmr.msra.gmra.mrb[2].mxu0 %v563_v38  ;;  %v917_v30 = vsub.s32 0, %v916_v29  ;;  %v921_v32 = vsub.s32 1, %v916_v29 }
 0x108   : > { %715 = vmatprep.mubr.f32.mxu0 %v1397_v23 }
 0x109   : > { %1089 = vmatmul.mubr.msk.f32.vlgmr.msra.gmra.mrb[2].mxu1 %vm1088_vm4, %v568_v42  ;;  %v570_v49 = vsel %vm567_vm3, %v568_v42, %v569_v41  ;;  %v576_v50 = vsel %vm290_vm1, %v574_v43, %v575_v40  ;;  %v918_v21 = vrot.slane %v913_v31, %v917_v30 }
 0x10a   : > { %1338 = vmatpush1.bf16.msra.mxu1 %v1337_v39  ;;  %792 = vmatprep.mubr.f32.mxu1 %v1397_v23 }
 0x10b   : > { %716 = vmatmul.mubr.f32.gmra.mrb[4].mxu0 %v1764_v35  ;;  %1340 = vmatprep.subr.bf16.mxu1 %v1339_v44 }
 0x10d   : > { %793 = vmatmul.mubr.f32.gmra.mrb[4].mxu1 %v570_v49 }
 0x10e   : > { %1342 = vmatpush1.bf16.msra.mxu1 %v1341_v51  ;;  %896 = vmatprep.mubr.f32.mxu1 %v1397_v23 }
 0x10f   : > { %1344 = vmatprep.subr.bf16.mxu1 %v1343_v52 }
 0x112   : > { %1346 = vmatpush1.bf16.msra.mxu1 %v1345_v57 }
 0x113   : > { %1348 = vmatprep.subr.bf16.mxu1 %v1347_v58 }
 0x116   : > { %1350 = vmatpush1.bf16.msra.mxu1 %v1349_v63 }
 0x117   : > { %1352 = vmatprep.subr.bf16.mxu1 %v1351_v0 }
 0x11a   : > { %1354 = vmatpush1.bf16.msra.mxu1 %v1353_v5 }
 0x11b   : > { %1356 = vmatprep.subr.bf16.mxu1 %v1355_v6 }
 0x11e   : > { %1358 = vmatpush1.bf16.msra.mxu1 %v1357_v11 }
 0x11f   : > { %1360 = vmatprep.subr.bf16.mxu1 %v1359_v12 }
 0x122   : > { %1362 = vmatpush1.bf16.msra.mxu1 %v1361_v17 }
 0x123   : > { %1364 = vmatprep.subr.bf16.mxu1 %v1363_v18 }
 0x126   : > { %1366 = vmatpush1.bf16.msra.mxu1 %v1365_v22 }
 0x129   : > { %897 = vmatmul.mubr.f32.vlgmr.msra.gmra.mrb[2].mxu1 %v576_v50 }
 0x12a   : > { %902 = vmatprep.mubr.f32.mxu1 %v1397_v23  ;;  %v922_v23 = vrot.slane %v913_v31, %v921_v32 }
 0x12d   : > { %1122 = vmatmul.mubr.msk.f32.gmra.mrb[4].mxu1 %vm290_vm1, %v575_v40 }
 0x1da   : > { %v711_v24 = vpop.f32.mrb[2].mxu0 }
 0x1db   : > { %v713_v25 = vpop.f32.mrb[3].mxu0 }
 0x1de   : > { %v717_v26 = vpop.f32.mrb[4].mxu0 }
 0x1df   : > { %v719_v27 = vpop.f32.mrb[5].mxu0 }
 0x1fc   : > { %v898_v33 = vpop.f32.mrb[2].mxu1 }
 0x1fd   : > { %v1369_v34 = vadd.f32 %v898_v33, %v711_v24  ;;  %v900_v35 = vpop.f32.mrb[3].mxu1 }
 0x1fe   : > { %v1370_v36 = vadd.f32 %v900_v35, %v713_v25 }
 0x1ff   : > { %v925_v37 = vadd.f32 %v1369_v34, %v918_v21 }
 0x200   : > { %v926_v38 = vadd.f32 %v1370_v36, %v922_v23  ;;  %v904_v39 = vpop.f32.mrb[4].mxu1 }
 0x201   : > { %929 = vst [vmem:[%s264_s18] sm:$0xff] %v925_v37  ;;  %v1371_v40 = vadd.f32 %v904_v39, %v717_v26  ;;  %v906_v41 = vpop.f32.mrb[5].mxu1 }
 0x202   : > { %930 = vst [vmem:[%s264_s18 + $0x8] sm:$0xff] %v926_v38  ;;  %v1372_v42 = vadd.f32 %v906_v41, %v719_v27 }
 0x203   : > { %v927_v43 = vadd.f32 %v1371_v40, %v918_v21 }
 0x204   : > { %v928_v44 = vadd.f32 %v1372_v42, %v922_v23 }
 0x205   : > { %931 = vst [vmem:[%s264_s18 + $0x10] sm:$0xff] %v927_v43 }
 0x206   : > { %932 = vst [vmem:[%s264_s18 + $0x18] sm:$0xff] %v928_v44 }
 0x207 PF: > { %s17_s21 = sadd.s32 1, %s1395_s21  }
 0x208   : > { %p14_p4 = scmp.ge.s32.totalorder %s17_s21, 4  }
 0x20a   :  { %16 = sbr.rel (!%p14_p4) target bundleno = 1 (0x1), region = 86 }

</bundles_post_ra>
